<compile_context>
chip_gen: v7x
topology: tpu7x:2x2x1
jax: 0.10.0
libtpu: 0.0.40
codegen_flags: <defaults>
</compile_context>

<pallas_src>
import jax
import jax.numpy as jnp
from jax import lax
from jax.experimental import pallas as pl
from jax.experimental.pallas import tpu as pltpu


def _logreg_kernel(x_ref, w_ref, b_ref, out_ref):
    # x_ref: (TB, F) f32 VMEM, w_ref: (C=2, F) f32 VMEM,
    # b_ref: (C=2,) f32 SMEM, out_ref: (C=2, TB) f32 VMEM.
    x = x_ref[...]
    w = w_ref[...]

    # (C, TB) logits: contract F (dim 1 of both operands) — no transposes anywhere.
    logits = lax.dot_general(
        w, x,
        dimension_numbers=(((1,), (1,)), ((), ())),
        preferred_element_type=jnp.float32,
    )

    z0 = logits[0:1, :] + b_ref[0]          # (1, TB)
    z1 = logits[1:2, :] + b_ref[1]          # (1, TB)

    # C=2-specialized, numerically stable log_softmax over the class axis (pure VPU/EUP).
    m = jnp.maximum(z0, z1)
    lse = m + jnp.log(1.0 + jnp.exp(-jnp.abs(z0 - z1)))

    out_ref[0:1, :] = z0 - lse
    out_ref[1:2, :] = z1 - lse


def logistic_regression_forward(x, weight, bias, *, tile_b=512):
    """x: (B, F) f32, weight: (C, F) f32 (PyTorch Linear layout), bias: (C,) f32.
    Returns (B, C) log-probabilities == F.log_softmax(Linear(x), dim=1)."""
    x = jnp.asarray(x, jnp.float32)
    weight = jnp.asarray(weight, jnp.float32)
    bias = jnp.asarray(bias, jnp.float32)

    B, F = x.shape
    C = weight.shape[0]
    assert C == 2, "kernel is specialized for n_classes == 2"

    if B % tile_b != 0:
        # Small / ragged batch: single un-gridded invocation, whole arrays in VMEM,
        # bias in SMEM. Avoids grid=(1,) per-step pipeline bookkeeping.
        out_cb = pl.pallas_call(
            _logreg_kernel,
            out_shape=jax.ShapeDtypeStruct((C, B), jnp.float32),
            in_specs=[
                pl.BlockSpec(memory_space=pltpu.MemorySpace.VMEM),   # x
                pl.BlockSpec(memory_space=pltpu.MemorySpace.VMEM),   # weight
                pl.BlockSpec(memory_space=pltpu.MemorySpace.SMEM),   # bias (2 scalars)
            ],
            out_specs=pl.BlockSpec(memory_space=pltpu.MemorySpace.VMEM),
        )(x, weight, bias)
    else:
        # Large batch: tile B (double-buffered DMA), weight/bias resident across the grid,
        # parallel axis so Mosaic can shard rows across TensorCores (v7x megacore).
        out_cb = pl.pallas_call(
            _logreg_kernel,
            out_shape=jax.ShapeDtypeStruct((C, B), jnp.float32),
            grid=(B // tile_b,),
            in_specs=[
                pl.BlockSpec((tile_b, F), lambda i: (i, 0)),
                pl.BlockSpec((C, F), lambda i: (0, 0)),
                pl.BlockSpec(memory_space=pltpu.MemorySpace.SMEM),
            ],
            out_specs=pl.BlockSpec((C, tile_b), lambda i: (0, i)),
            compiler_params=pltpu.CompilerParams(
                dimension_semantics=("parallel",)),
        )(x, weight, bias)

    # Tiny (2, B) -> (B, C) un-transpose in the wrapper to match module semantics.
    return out_cb.T


if __name__ == "__main__":
    in_features = 120
    n_classes = 2

    key = jax.random.PRNGKey(0)
    kx, kw, kb, kx2 = jax.random.split(key, 4)

    # nn.Linear-style init: U(-1/sqrt(F), 1/sqrt(F)).
    bound = 1.0 / (in_features ** 0.5)
    weight = jax.random.uniform(kw, (n_classes, in_features),
                                minval=-bound, maxval=bound, dtype=jnp.float32)
    bias = jax.random.uniform(kb, (n_classes,),
                              minval=-bound, maxval=bound, dtype=jnp.float32)

    def ref_fn(xv):
        return jax.nn.log_softmax(xv @ weight.T + bias, axis=1)

    # Small-batch path (no grid).
    x_small = jax.random.normal(kx, (8, in_features), dtype=jnp.float32)
    out_small = logistic_regression_forward(x_small, weight, bias)
    jax.block_until_ready(out_small)
    assert jnp.allclose(out_small, ref_fn(x_small), atol=1e-5, rtol=1e-5)

    # Tiled large-batch path (grid over B, parallel semantics).
    x_large = jax.random.normal(kx2, (1024, in_features), dtype=jnp.float32)
    out_large = logistic_regression_forward(x_large, weight, bias, tile_b=512)
    jax.block_until_ready(out_large)
    assert jnp.allclose(out_large, ref_fn(x_large), atol=1e-5, rtol=1e-5)

    print("KERNEL_OK")
</pallas_src>

<mosaic_0001>
module attributes {stable_mosaic.version = 11 : i64} {
  func.func @_logreg_kernel(%arg0: memref<8x120xf32, #tpu.memory_space<vmem>>, %arg1: memref<2x120xf32, #tpu.memory_space<vmem>>, %arg2: memref<2xf32, #tpu.memory_space<smem>>, %arg3: memref<2x8xf32, #tpu.memory_space<vmem>>) attributes {dimension_semantics = [], scalar_prefetch = 0 : i64, scratch_operands = 0 : i64, tpu.core_type = #tpu.core_type<tc>} {
    %c0 = arith.constant 0 : index
    %c0_0 = arith.constant 0 : index
    %0 = vector.load %arg0[%c0, %c0_0] : memref<8x120xf32, #tpu.memory_space<vmem>>, vector<8x120xf32>
    %c0_1 = arith.constant 0 : index
    %c0_2 = arith.constant 0 : index
    %1 = vector.load %arg1[%c0_1, %c0_2] : memref<2x120xf32, #tpu.memory_space<vmem>>, vector<2x120xf32>
    %cst = arith.constant dense<0.000000e+00> : vector<2x8xf32>
    %2 = tpu.matmul %1, %0, %cst {dimension_numbers = #tpu.dot_dimension_numbers<[1], [1], [0], [0], [0, 0, 1, 0], [], []>} : vector<2x120xf32>, vector<8x120xf32>, vector<2x8xf32> -> vector<2x8xf32>
    %3 = vector.extract_strided_slice %2 {offsets = [0, 0], sizes = [1, 8], strides = [1, 1]} : vector<2x8xf32> to vector<1x8xf32>
    %c0_3 = arith.constant 0 : index
    %4 = memref.load %arg2[%c0_3] : memref<2xf32, #tpu.memory_space<smem>>
    %5 = vector.broadcast %4 : f32 to vector<1x8xf32>
    %6 = arith.addf %3, %5 : vector<1x8xf32>
    %7 = vector.extract_strided_slice %2 {offsets = [1, 0], sizes = [1, 8], strides = [1, 1]} : vector<2x8xf32> to vector<1x8xf32>
    %c1 = arith.constant 1 : index
    %8 = memref.load %arg2[%c1] : memref<2xf32, #tpu.memory_space<smem>>
    %9 = vector.broadcast %8 : f32 to vector<1x8xf32>
    %10 = arith.addf %7, %9 : vector<1x8xf32>
    %11 = arith.maximumf %6, %10 : vector<1x8xf32>
    %12 = arith.subf %6, %10 : vector<1x8xf32>
    %13 = math.absf %12 : vector<1x8xf32>
    %cst_4 = arith.constant 0.000000e+00 : f32
    %14 = vector.broadcast %cst_4 : f32 to vector<1x8xf32>
    %15 = arith.subf %14, %13 : vector<1x8xf32>
    %16 = math.exp %15 : vector<1x8xf32>
    %cst_5 = arith.constant 1.000000e+00 : f32
    %17 = vector.broadcast %cst_5 : f32 to vector<1x8xf32>
    %18 = arith.addf %17, %16 : vector<1x8xf32>
    %19 = math.log %18 : vector<1x8xf32>
    %20 = arith.addf %11, %19 : vector<1x8xf32>
    %21 = arith.subf %6, %20 : vector<1x8xf32>
    %c0_6 = arith.constant 0 : index
    %c0_7 = arith.constant 0 : index
    %22 = vector.load %arg3[%c0_6, %c0_7] : memref<2x8xf32, #tpu.memory_space<vmem>>, vector<1x8xf32>
    tpu.vector_store %arg3[%c0_6, %c0_7], %21 {strides = array<i32>} : memref<2x8xf32, #tpu.memory_space<vmem>>, vector<1x8xf32>,
    %23 = arith.subf %10, %20 : vector<1x8xf32>
    %c1_8 = arith.constant 1 : index
    %c0_9 = arith.constant 0 : index
    %24 = vector.load %arg3[%c1_8, %c0_9] : memref<2x8xf32, #tpu.memory_space<vmem>>, vector<1x8xf32>
    tpu.vector_store %arg3[%c1_8, %c0_9], %23 {strides = array<i32>} : memref<2x8xf32, #tpu.memory_space<vmem>>, vector<1x8xf32>,
    return
  }
}

</mosaic_0001>

<bundles_post_ra>
// kernel: tpu_custom_call.1
= control target key start
LH: loop header
LB: loop body
LE: loop exit
PB: predicated region body
PF: predicated region fallthrough
CT: control target
= control target key end

     0   :  { %8 = vsyncpa [#allocation3], 0  ;;  %s299_s0 = inlined_call_operand.hbm [shape: f32[8,120], index: 0, kind: input, shape index: {}]   ;;  %s300_s1 = inlined_call_operand.vmem [shape: f32[2,120], index: 1, kind: input, shape index: {}]   ;;  %s301_s2 = inlined_call_operand.vmem [shape: f32[2], index: 2, kind: input, shape index: {}]   ;;  %s302_s3 = inlined_call_operand.hbm [shape: f32[2,8], index: 3, kind: output, shape index: {}]  }
   0x1   :  { %9 = vsyncpa [#allocation5], 0 }
   0x2   :  { %10 = vsyncpa [#allocation4], 0  ;;  %s29_s14 = sshll.u32 %s301_s2, 4  ;;  %s244_s15 = smov [#allocation2]   ;;  %s30_s14 = int_to_ptr.vmem [resolvable:$true] %s29_s14 }
   0x3   :  { %s17_s16 = sshll.u32 %s244_s15, 4  ;;  %s182_s19 = scalar_lea.hbm %s299_s0, 128  ;;  %s18_s16 = int_to_ptr.vmem [resolvable:$true] %s17_s16 }
   0x4   :  { %p183_p0 = scmp.ne.s32.totalorder %s299_s0, %s182_s19  ;;  %p186_p1 = scmp.lt.u32.totalorder %s182_s19, %s299_s0 }
   0x6   :  { %p188_p2 = pnand %p186_p1, %p183_p0 }
   0x8   :  { %191 = shalt.err (!%p188_p2)
}
   0x9   :  { %s192_s24 = scalar_lea.vmem %s18_s16, 128  ;;  %p197_p4 = scmp.lt.s32.totalorder %s18_s16, %s18_s16 }
   0xa   :  { %p193_p3 = scmp.ne.s32.totalorder %s18_s16, %s192_s24  ;;  %p198_p5 = scmp.lt.s32.totalorder %s192_s24, %s192_s24 }
   0xc   :  { %p199_p6 = por %p198_p5, %p197_p4 }
   0xe   :  { %p200_p7 = pnand %p199_p6, %p193_p3 }
  0x10   :  { %203 = shalt.err (!%p200_p7)
}
  0x11   :  { %20 = dma.hbm_to_vmem [thread:$0]  %s299_s0, 128, %s18_s16, [#allocation3]  }
  0x12   :  { %s204_s26 = scalar_lea.vmem %s30_s14, 16  ;;  %p209_p9 = scmp.lt.s32.totalorder %s30_s14, %s30_s14 }
  0x13   :  { %p205_p8 = scmp.ne.s32.totalorder %s30_s14, %s204_s26  ;;  %p210_p10 = scmp.lt.s32.totalorder %s204_s26, %s204_s26 }
  0x15   :  { %p211_p11 = por %p210_p10, %p209_p9 }
  0x17   :  { %p212_p12 = pnand %p211_p11, %p205_p8 }
  0x19   :  { %215 = shalt.err (!%p212_p12)
}
  0x1a   :  { %s245_s27 = smov [#allocation6]  }
  0x1b   :  { %32 = dma.vmem_to_smem %s30_s14, 16, %s245_s27, [#allocation5]  }
  0x1c   :  { %238 = dma.done.wait [#allocation3], 128  }
  0x1d   :  { %239 = vsyncadd [#allocation3], 4294967168 }
  0x1e   :  { %240 = dma.done.wait [#allocation5], 16  }
  0x1f   :  { %241 = vsyncadd [#allocation5], 4294967280 }
  0x20   :  { %39 = sfence }
  0x21   :  { %v40_v0 = vld [vmem:[#allocation2] sm:$0xff]  ;;  %vm42_vm0 = vcmask 982016   ;;  %v246_v1 = vmov 0.0   ;;  %vm247_vm1 = vmmov 0   ;;  %s165_s29 = sld [smem:[#allocation6 + $0x1]]  ;;  %s119_s30 = sld [smem:[#allocation6]] }
  0x22   :  { %168 = vmatprep.subr.mxu0 %v246_v1  ;;  %170 = vmatprep.mubr.msk.f32.mxu0 %vm247_vm1, %v246_v1  ;;  %v41_v2 = vld [vmem:[%s300_s1] sm:$0x3]  ;;  %vm139_vm2 = vcmask 57344   ;;  %s248_s1 = smov [#allocation7]   ;;  %vm145_vm3 = vcmask 58369  }
  0x23   :  { %169 = vmatpush3.xpose.msk.msra.mxu0 %vm42_vm0, %v40_v0  ;;  %s153_s4 = sshll.u32 %s248_s1, 4  ;;  %s154_s4 = int_to_ptr.vmem [resolvable:$true] %s153_s4 }
  0x24   :  { %s216_s5 = scalar_lea.vmem %s154_s4, 32  ;;  %p221_p0 = scmp.lt.s32.totalorder %s154_s4, %s154_s4 }
  0x25   :  { %p217_p13 = scmp.ne.s32.totalorder %s154_s4, %s216_s5  ;;  %p222_p1 = scmp.lt.s32.totalorder %s216_s5, %s216_s5 }
  0x26   :  { %171 = vmatmul.mubr.msk.f32.vlgmr.msra.gmra.mrb[0].mxu0 %vm42_vm0, %v41_v2 }
  0x27   :  { %v123_v3 = vstv %s165_s29  ;;  %v120_v5 = vstv %s119_s30  ;;  %p223_p2 = por %p222_p1, %p221_p0 }
  0x29   :  { %p224_p3 = pnand %p223_p2, %p217_p13 }
  0xf9   :  { %v115_v4 = vpop.f32.mrb[0].mxu0 }
  0xfa   :  { %v124_v6 = vadd.f32 %v123_v3, %v115_v4  ;;  %v172_v7 = vpop.f32.mrb[1].mxu0  ;;  %v121_v8 = vadd.f32 %v120_v5, %v115_v4 }
  0xfc   :  { %v126_v9 = vrot.slane %v124_v6, 1 }
  0xfe   :  { %v129_v10 = vsub.f32 %v121_v8, %v126_v9  ;;  %v128_v17 = vmax.f32 %v121_v8, %v126_v9 }
 0x100   :  { %v130_v11 = vand.u32 2147483647, %v129_v10 }
 0x102   :  { %v131_v12 = vsub.f32 0.0, %v130_v11 }
 0x104   :  { %v132_v13 = vmul.f32 1.442695, %v131_v12 }
 0x106   :  { %178 = vpow2.f32 %v132_v13 }
 0x110   :  { %v179_v14 = vpop.eup %178 }
 0x111   :  { %v134_v15 = vadd.f32 1.0, %v179_v14 }
 0x113   :  { %180 = vlog2.f32 %v134_v15 }
 0x11d   :  { %v181_v16 = vpop.eup %180 }
 0x11e   :  { %v136_v18 = vmul.f32 0.6931472, %v181_v16 }
 0x120   :  { %v137_v19 = vadd.f32 %v136_v18, %v128_v17 }
 0x122   :  { %v138_v20 = vsub.f32 %v121_v8, %v137_v19  ;;  %v142_v21 = vrot.slane %v137_v19, 7 }
 0x124   :  { %140 = vst.msk [vmem:[#allocation7] sm:$0x1] %vm139_vm2, %v138_v20  ;;  %v144_v22 = vsub.f32 %v124_v6, %v142_v21 }
 0x126   :  { %146 = vst.msk [vmem:[#allocation7] sm:$0x2] %vm145_vm3, %v144_v22 }
 0x127   :  { %227 = shalt.err (!%p224_p3)
}
 0x128   :  { %s228_s8 = scalar_lea.hbm %s302_s3, 32 }
 0x129   :  { %p229_p4 = scmp.ne.s32.totalorder %s302_s3, %s228_s8  ;;  %p232_p5 = scmp.lt.u32.totalorder %s228_s8, %s302_s3 }
 0x12b   :  { %p234_p6 = pnand %p232_p5, %p229_p4 }
 0x12d   :  { %237 = shalt.err (!%p234_p6)
}
 0x12e   :  { %156 = dma.vmem_to_hbm [thread:$0]  %s154_s4, 32, %s302_s3, [#allocation4]  }
 0x12f   :  { %242 = dma.done.wait [#allocation4], 32  }
 0x130   :  { %243 = vsyncadd [#allocation4], 4294967264 }
 0x131   :  { %160 = vsyncpa [#allocation3], 1 }
 0x132   :  { %161 = vsyncpa [#allocation4], 1 }
 0x133   :  { %162 = vsyncpa [#allocation5], 1 }

</bundles_post_ra>
